<compile_context>
chip_gen: v5e
topology: v5e:2x2
jax: 0.10.0
libtpu: 0.0.40
codegen_flags: <defaults>
</compile_context>

<pallas_src>
import functools

import jax
import jax.numpy as jnp
from jax.experimental import pallas as pl
from jax.experimental.pallas import tpu as pltpu


def _conv_in_lrelu_kernel(xcol_ref, w_ref, g_ref, b_ref, o_ref,
                          sum_ref, ssq_ref, *, s_total):
    # xcol_ref: (1, Kp, tS) bf16     w_ref: (Coutp, Kp) bf16
    # g_ref/b_ref: (Coutp, 1) f32    o_ref: (1, Coutp, tS) f32
    # sum_ref/ssq_ref: (Coutp, 1) f32 VMEM scratch, persistent across grid steps.
    phase = pl.program_id(1)   # 0: accumulate stats, 1: normalize + activate + store
    s_idx = pl.program_id(2)   # S-tile index

    @pl.when(jnp.logical_and(phase == 0, s_idx == 0))
    def _init():
        sum_ref[...] = jnp.zeros_like(sum_ref)
        ssq_ref[...] = jnp.zeros_like(ssq_ref)

    # Conv3d as a channel-major matmul on the MXU: (Coutp, Kp) @ (Kp, tS) -> (Coutp, tS),
    # bf16 operands with f32 accumulation.  The conv bias is omitted on purpose: it is
    # exactly cancelled by the InstanceNorm mean subtraction.
    y = jnp.dot(w_ref[...], xcol_ref[0], preferred_element_type=jnp.float32)

    @pl.when(phase == 0)
    def _accumulate_stats():
        # One-pass streamed statistics (lane reductions go to the XLU slot).
        sum_ref[...] += jnp.sum(y, axis=1, keepdims=True)
        ssq_ref[...] += jnp.sum(y * y, axis=1, keepdims=True)

    @pl.when(phase == 1)
    def _normalize():
        inv_n = jnp.float32(1.0 / s_total)
        mean = sum_ref[...] * inv_n                                   # (Coutp, 1)
        var = jnp.maximum(ssq_ref[...] * inv_n - mean * mean, 0.0)    # E[y^2] - E[y]^2
        scale = jax.lax.rsqrt(var + 1e-5) * g_ref[...]                # fold gamma
        shift = b_ref[...] - mean * scale                             # fold beta & mean
        yn = y * scale + shift                                        # one FMA pass
        o_ref[0] = jnp.where(yn >= 0, yn, 0.01 * yn).astype(o_ref.dtype)


def _im2col_channel_major(x, kernel_size, stride, padding):
    """x: (N, Cin, D, H, W) -> patches (N, Cin*kd*kh*kw, Do*Ho*Wo) (channel/tap-major)."""
    N, Cin, D, H, W = x.shape
    kd, kh, kw = kernel_size
    sd, sh, sw = stride
    pd, ph, pw = padding
    xp = jnp.pad(x, ((0, 0), (0, 0), (pd, pd), (ph, ph), (pw, pw)))
    Do = (D + 2 * pd - kd) // sd + 1
    Ho = (H + 2 * ph - kh) // sh + 1
    Wo = (W + 2 * pw - kw) // sw + 1
    slices = []
    for od in range(kd):
        for oh in range(kh):
            for ow in range(kw):
                slices.append(xp[:, :,
                                 od:od + sd * Do:sd,
                                 oh:oh + sh * Ho:sh,
                                 ow:ow + sw * Wo:sw])          # (N, Cin, Do, Ho, Wo)
    # (N, Cin, kk, Do, Ho, Wo): k index = cin*kk + (od*kh*kw + oh*kw + ow),
    # matching PyTorch's weight.reshape(Cout, Cin*kd*kh*kw) flatten order.
    p = jnp.stack(slices, axis=2)
    p = p.reshape(N, Cin * kd * kh * kw, Do * Ho * Wo)         # (N, K, S), S on lanes
    return p, (Do, Ho, Wo)


def _pick_s_tile(S, Kp):
    """Largest lane-aligned S-tile dividing S whose bf16 input block fits a 4 MiB budget."""
    budget = 4 * 1024 * 1024
    for t in (4096, 2048, 1024, 512, 256, 128):
        if S % t == 0 and Kp * t * 2 <= budget:
            return t
    return S  # small / odd S: a block equal to the full array dim is legal


@functools.partial(jax.jit,
                   static_argnames=("kernel_size", "stride", "padding", "s_tile"))
def conv_dropout_norm_relu(x, weight, bias, gamma, beta,
                           kernel_size=(3, 3, 3), stride=(1, 1, 1),
                           padding=(1, 1, 1), s_tile=None):
    """Forward pass.  x: (N, Cin, D, H, W) NCDHW; weight: (Cout, Cin, kd, kh, kw)."""
    del bias  # exactly cancelled by the InstanceNorm mean subtraction (dead work)
    N, Cin = x.shape[0], x.shape[1]
    Cout = weight.shape[0]
    kd, kh, kw = kernel_size

    patches, (Do, Ho, Wo) = _im2col_channel_major(x, kernel_size, stride, padding)
    K = Cin * kd * kh * kw
    S = Do * Ho * Wo

    # Pad K only to a multiple of 16 (bf16 sublane packing) and Cout to a multiple of 8.
    Kp = -(-K // 16) * 16
    Coutp = -(-Cout // 8) * 8

    patches = jnp.pad(patches, ((0, 0), (0, Kp - K), (0, 0))).astype(jnp.bfloat16)
    w2 = jnp.pad(weight.reshape(Cout, K),
                 ((0, Coutp - Cout), (0, Kp - K))).astype(jnp.bfloat16)
    g2 = jnp.pad(gamma.reshape(Cout, 1).astype(jnp.float32), ((0, Coutp - Cout), (0, 0)))
    b2 = jnp.pad(beta.reshape(Cout, 1).astype(jnp.float32), ((0, Coutp - Cout), (0, 0)))

    tS = _pick_s_tile(S, Kp) if s_tile is None else s_tile
    assert S % tS == 0, (S, tS)
    nS = S // tS

    # Explicit VMEM budget: double-buffered input/output tiles + resident weights + stats.
    in_block = Kp * tS * 2           # bf16
    out_block = Coutp * tS * 4       # f32
    w_bytes = Coutp * Kp * 2
    needed = 2 * in_block + 2 * out_block + 2 * w_bytes + 8 * Coutp * 4
    vmem_limit = int(min(max(2 * needed + (1 << 20), 16 << 20), 56 << 20))

    kernel = functools.partial(_conv_in_lrelu_kernel, s_total=S)

    out = pl.pallas_call(
        kernel,
        out_shape=jax.ShapeDtypeStruct((N, Coutp, S), jnp.float32),
        grid_spec=pltpu.PrefetchScalarGridSpec(
            num_scalar_prefetch=0,
            # (batch, phase, S-tile): phase 0 streams stats, phase 1 normalizes + stores.
            grid=(N, 2, nS),
            in_specs=[
                pl.BlockSpec((1, Kp, tS), lambda n, p, s: (n, 0, s)),
                pl.BlockSpec((Coutp, Kp), lambda n, p, s: (0, 0)),
                pl.BlockSpec((Coutp, 1), lambda n, p, s: (0, 0)),
                pl.BlockSpec((Coutp, 1), lambda n, p, s: (0, 0)),
            ],
            out_specs=pl.BlockSpec((1, Coutp, tS), lambda n, p, s: (n, 0, s)),
            scratch_shapes=[
                pltpu.VMEM((Coutp, 1), jnp.float32),   # per-channel sum
                pltpu.VMEM((Coutp, 1), jnp.float32),   # per-channel sum of squares
            ],
        ),
        compiler_params=pltpu.CompilerParams(
            dimension_semantics=("parallel", "arbitrary", "arbitrary"),
            vmem_limit_bytes=vmem_limit,
        ),
    )(patches, w2, g2, b2)

    # (N, Coutp, S) -> (N, Cout, Do, Ho, Wo): slice channel padding + pure reshape.
    return out[:, :Cout, :].reshape(N, Cout, Do, Ho, Wo)


def _reference(x, weight, bias, gamma, beta, stride=(1, 1, 1), padding=(1, 1, 1),
               quantize_matmul=False):
    """Pure-JAX reference.  quantize_matmul=True matches the kernel's bf16 operands."""
    if quantize_matmul:
        x = x.astype(jnp.bfloat16).astype(jnp.float32)
        weight = weight.astype(jnp.bfloat16).astype(jnp.float32)
    y = jax.lax.conv_general_dilated(
        x, weight, window_strides=stride,
        padding=[(padding[0],) * 2, (padding[1],) * 2, (padding[2],) * 2],
        dimension_numbers=("NCDHW", "OIDHW", "NCDHW"))
    y = y + bias.reshape(1, -1, 1, 1, 1)
    mean = jnp.mean(y, axis=(2, 3, 4), keepdims=True)
    var = jnp.mean((y - mean) ** 2, axis=(2, 3, 4), keepdims=True)
    yn = (y - mean) * jax.lax.rsqrt(var + 1e-5)
    yn = yn * gamma.reshape(1, -1, 1, 1, 1) + beta.reshape(1, -1, 1, 1, 1)
    return jnp.where(yn >= 0, yn, 0.01 * yn)


if __name__ == "__main__":
    # Small shapes consistent with the module: N=2, C_in=4, C_out=8, D=H=W=8,
    # kernel_size=3, stride=1, padding=1.
    N, Cin, Cout, D, H, W = 2, 4, 8, 8, 8, 8
    key = jax.random.PRNGKey(0)
    kx, kw_, kb, kg, kbe = jax.random.split(key, 5)

    x = jax.random.normal(kx, (N, Cin, D, H, W), dtype=jnp.float32)
    weight = 0.1 * jax.random.normal(kw_, (Cout, Cin, 3, 3, 3), dtype=jnp.float32)
    bias = 0.1 * jax.random.normal(kb, (Cout,), dtype=jnp.float32)
    gamma = 1.0 + 0.1 * jax.random.normal(kg, (Cout,), dtype=jnp.float32)
    beta = 0.1 * jax.random.normal(kbe, (Cout,), dtype=jnp.float32)

    out = jax.block_until_ready(conv_dropout_norm_relu(x, weight, bias, gamma, beta))
    assert out.shape == (N, Cout, D, H, W)

    # Also exercise the streamed-stats path (multiple S tiles per batch element).
    out_tiled = jax.block_until_ready(
        conv_dropout_norm_relu(x, weight, bias, gamma, beta, s_tile=128))

    # Strict check against a reference whose conv operands are quantized to bf16 like the
    # kernel's (products are exact; only accumulation order / var formula differ).
    ref_q = _reference(x, weight, bias, gamma, beta, quantize_matmul=True)
    assert jnp.allclose(out, ref_q, rtol=2e-3, atol=2e-3), "mismatch vs bf16-matched reference"
    assert jnp.allclose(out_tiled, ref_q, rtol=2e-3, atol=2e-3), "tiled mismatch vs reference"

    # Coarse sanity check against the exact f32 reference (bounds bf16 quantization error).
    ref_f32 = _reference(x, weight, bias, gamma, beta)
    assert jnp.allclose(out, ref_f32, rtol=1e-1, atol=1e-1), "mismatch vs f32 reference"

    print("KERNEL_OK")
</pallas_src>

<mosaic_0001>
module attributes {stable_mosaic.version = 11 : i64} {
  func.func @_conv_in_lrelu_kernel(%arg0: i32, %arg1: i32, %arg2: i32, %arg3: memref<1x112x512xbf16, #tpu.memory_space<vmem>>, %arg4: memref<8x112xbf16, #tpu.memory_space<vmem>>, %arg5: memref<8x1xf32, #tpu.memory_space<vmem>>, %arg6: memref<8x1xf32, #tpu.memory_space<vmem>>, %arg7: memref<1x8x512xf32, #tpu.memory_space<vmem>>, %arg8: memref<8x1xf32, #tpu.memory_space<vmem>>, %arg9: memref<8x1xf32, #tpu.memory_space<vmem>>) attributes {dimension_semantics = [#tpu.dimension_semantics<parallel>, #tpu.dimension_semantics<arbitrary>, #tpu.dimension_semantics<arbitrary>], iteration_bounds = array<i64: 2, 2, 1>, scalar_prefetch = 0 : i64, scratch_operands = 2 : i64, tpu.core_type = #tpu.core_type<tc>, window_params = [{transform_indices = @transform_0, window_bounds = array<i64: 1, 112, 512>}, {pipeline_mode = #tpu.pipeline_mode<synchronous>, transform_indices = @transform_1, window_bounds = array<i64: 8, 112>}, {pipeline_mode = #tpu.pipeline_mode<synchronous>, transform_indices = @transform_2, window_bounds = array<i64: 8, 1>}, {pipeline_mode = #tpu.pipeline_mode<synchronous>, transform_indices = @transform_3, window_bounds = array<i64: 8, 1>}, {transform_indices = @transform_4, window_bounds = array<i64: 1, 8, 512>}]} {
    %c0_i32 = arith.constant 0 : i32
    %0 = arith.cmpi eq, %arg1, %c0_i32 : i32
    %c0_i32_0 = arith.constant 0 : i32
    %1 = arith.cmpi eq, %arg2, %c0_i32_0 : i32
    %2 = arith.andi %0, %1 : i1
    %3 = arith.extui %2 : i1 to i32
    %c0_i32_1 = arith.constant 0 : i32
    %4 = arith.cmpi ne, %3, %c0_i32_1 : i32
    scf.if %4 {
      %cst_9 = arith.constant 0.000000e+00 : f32
      %15 = vector.broadcast %cst_9 : f32 to vector<8x1xf32>
      %c0_10 = arith.constant 0 : index
      %c0_11 = arith.constant 0 : index
      %16 = vector.load %arg8[%c0_10, %c0_11] : memref<8x1xf32, #tpu.memory_space<vmem>>, vector<8x1xf32>
      tpu.vector_store %arg8[%c0_10, %c0_11], %15 {strides = array<i32>} : memref<8x1xf32, #tpu.memory_space<vmem>>, vector<8x1xf32>,
      %cst_12 = arith.constant 0.000000e+00 : f32
      %17 = vector.broadcast %cst_12 : f32 to vector<8x1xf32>
      %c0_13 = arith.constant 0 : index
      %c0_14 = arith.constant 0 : index
      %18 = vector.load %arg9[%c0_13, %c0_14] : memref<8x1xf32, #tpu.memory_space<vmem>>, vector<8x1xf32>
      tpu.vector_store %arg9[%c0_13, %c0_14], %17 {strides = array<i32>} : memref<8x1xf32, #tpu.memory_space<vmem>>, vector<8x1xf32>,
    } else {
    }
    %c0 = arith.constant 0 : index
    %c0_2 = arith.constant 0 : index
    %5 = vector.load %arg4[%c0, %c0_2] : memref<8x112xbf16, #tpu.memory_space<vmem>>, vector<8x112xbf16>
    %c0_3 = arith.constant 0 : index
    %c0_4 = arith.constant 0 : index
    %c0_5 = arith.constant 0 : index
    %6 = vector.load %arg3[%c0_3, %c0_4, %c0_5] : memref<1x112x512xbf16, #tpu.memory_space<vmem>>, vector<1x112x512xbf16>
    %7 = vector.shape_cast %6 : vector<1x112x512xbf16> to vector<112x512xbf16>
    %cst = arith.constant dense<0.000000e+00> : vector<8x512xf32>
    %8 = tpu.matmul %5, %7, %cst {dimension_numbers = #tpu.dot_dimension_numbers<[1], [0], [0], [1], [0, 0, 1, 1], [], []>} : vector<8x112xbf16>, vector<112x512xbf16>, vector<8x512xf32> -> vector<8x512xf32>
    %c0_i32_6 = arith.constant 0 : i32
    %9 = arith.cmpi eq, %arg1, %c0_i32_6 : i32
    %10 = arith.extui %9 : i1 to i32
    %c0_i32_7 = arith.constant 0 : i32
    %11 = arith.cmpi ne, %10, %c0_i32_7 : i32
    scf.if %11 {
      %c0_9 = arith.constant 0 : index
      %c0_10 = arith.constant 0 : index
      %15 = vector.load %arg8[%c0_9, %c0_10] : memref<8x1xf32, #tpu.memory_space<vmem>>, vector<8x1xf32>
      %cst_11 = arith.constant dense<0.000000e+00> : vector<8xf32>
      %16 = vector.multi_reduction <add>, %8, %cst_11 [1] : vector<8x512xf32> to vector<8xf32>
      %17 = vector.shape_cast %16 : vector<8xf32> to vector<8x1xf32>
      %18 = arith.addf %15, %17 : vector<8x1xf32>
      %c0_12 = arith.constant 0 : index
      %c0_13 = arith.constant 0 : index
      %19 = vector.load %arg8[%c0_12, %c0_13] : memref<8x1xf32, #tpu.memory_space<vmem>>, vector<8x1xf32>
      tpu.vector_store %arg8[%c0_12, %c0_13], %18 {strides = array<i32>} : memref<8x1xf32, #tpu.memory_space<vmem>>, vector<8x1xf32>,
      %c0_14 = arith.constant 0 : index
      %c0_15 = arith.constant 0 : index
      %20 = vector.load %arg9[%c0_14, %c0_15] : memref<8x1xf32, #tpu.memory_space<vmem>>, vector<8x1xf32>
      %21 = arith.mulf %8, %8 : vector<8x512xf32>
      %cst_16 = arith.constant dense<0.000000e+00> : vector<8xf32>
      %22 = vector.multi_reduction <add>, %21, %cst_16 [1] : vector<8x512xf32> to vector<8xf32>
      %23 = vector.shape_cast %22 : vector<8xf32> to vector<8x1xf32>
      %24 = arith.addf %20, %23 : vector<8x1xf32>
      %c0_17 = arith.constant 0 : index
      %c0_18 = arith.constant 0 : index
      %25 = vector.load %arg9[%c0_17, %c0_18] : memref<8x1xf32, #tpu.memory_space<vmem>>, vector<8x1xf32>
      tpu.vector_store %arg9[%c0_17, %c0_18], %24 {strides = array<i32>} : memref<8x1xf32, #tpu.memory_space<vmem>>, vector<8x1xf32>,
    } else {
    }
    %c1_i32 = arith.constant 1 : i32
    %12 = arith.cmpi eq, %arg1, %c1_i32 : i32
    %13 = arith.extui %12 : i1 to i32
    %c0_i32_8 = arith.constant 0 : i32
    %14 = arith.cmpi ne, %13, %c0_i32_8 : i32
    scf.if %14 {
      %c0_9 = arith.constant 0 : index
      %c0_10 = arith.constant 0 : index
      %15 = vector.load %arg8[%c0_9, %c0_10] : memref<8x1xf32, #tpu.memory_space<vmem>>, vector<8x1xf32>
      %cst_11 = arith.constant 0.001953125 : f32
      %16 = vector.broadcast %cst_11 : f32 to vector<8x1xf32>
      %17 = arith.mulf %15, %16 : vector<8x1xf32>
      %c0_12 = arith.constant 0 : index
      %c0_13 = arith.constant 0 : index
      %18 = vector.load %arg9[%c0_12, %c0_13] : memref<8x1xf32, #tpu.memory_space<vmem>>, vector<8x1xf32>
      %cst_14 = arith.constant 0.001953125 : f32
      %19 = vector.broadcast %cst_14 : f32 to vector<8x1xf32>
      %20 = arith.mulf %18, %19 : vector<8x1xf32>
      %21 = arith.mulf %17, %17 : vector<8x1xf32>
      %22 = arith.subf %20, %21 : vector<8x1xf32>
      %cst_15 = arith.constant 0.000000e+00 : f32
      %23 = vector.broadcast %cst_15 : f32 to vector<8x1xf32>
      %24 = arith.maximumf %22, %23 : vector<8x1xf32>
      %cst_16 = arith.constant 9.99999974E-6 : f32
      %25 = vector.broadcast %cst_16 : f32 to vector<8x1xf32>
      %26 = arith.addf %24, %25 : vector<8x1xf32>
      %27 = math.rsqrt %26 : vector<8x1xf32>
      %c0_17 = arith.constant 0 : index
      %c0_18 = arith.constant 0 : index
      %28 = vector.load %arg5[%c0_17, %c0_18] : memref<8x1xf32, #tpu.memory_space<vmem>>, vector<8x1xf32>
      %29 = arith.mulf %27, %28 : vector<8x1xf32>
      %c0_19 = arith.constant 0 : index
      %c0_20 = arith.constant 0 : index
      %30 = vector.load %arg6[%c0_19, %c0_20] : memref<8x1xf32, #tpu.memory_space<vmem>>, vector<8x1xf32>
      %31 = arith.mulf %17, %29 : vector<8x1xf32>
      %32 = arith.subf %30, %31 : vector<8x1xf32>
      %33 = vector.broadcast %29 : vector<8x1xf32> to vector<8x512xf32>
      %34 = arith.mulf %8, %33 : vector<8x512xf32>
      %35 = vector.broadcast %32 : vector<8x1xf32> to vector<8x512xf32>
      %36 = arith.addf %34, %35 : vector<8x512xf32>
      %cst_21 = arith.constant 0.000000e+00 : f32
      %37 = vector.broadcast %cst_21 : f32 to vector<8x512xf32>
      %38 = arith.cmpf oge, %36, %37 : vector<8x512xf32>
      %cst_22 = arith.constant 0.00999999977 : f32
      %39 = vector.broadcast %cst_22 : f32 to vector<8x512xf32>
      %40 = arith.mulf %39, %36 : vector<8x512xf32>
      %41 = arith.select %38, %36, %40 : vector<8x512xi1>, vector<8x512xf32>
      %c0_23 = arith.constant 0 : index
      %c0_24 = arith.constant 0 : index
      %c0_25 = arith.constant 0 : index
      %42 = vector.load %arg7[%c0_23, %c0_24, %c0_25] : memref<1x8x512xf32, #tpu.memory_space<vmem>>, vector<1x8x512xf32>
      %43 = vector.shape_cast %42 : vector<1x8x512xf32> to vector<8x512xf32>
      %44 = vector.shape_cast %41 : vector<8x512xf32> to vector<1x8x512xf32>
      tpu.vector_store %arg7[%c0_23, %c0_24, %c0_25], %44 {strides = array<i32>} : memref<1x8x512xf32, #tpu.memory_space<vmem>>, vector<1x8x512xf32>,
    } else {
    }
    return
  }
  func.func @transform_0(%arg0: i32, %arg1: i32, %arg2: i32) -> (i32, i32, i32) {
    %c0_i32 = arith.constant 0 : i32
    %c0_i32_0 = arith.constant 0 : i32
    return %arg0, %c0_i32, %arg2 : i32, i32, i32
  }
  func.func @transform_1(%arg0: i32, %arg1: i32, %arg2: i32) -> (i32, i32) {
    %c0_i32 = arith.constant 0 : i32
    %c0_i32_0 = arith.constant 0 : i32
    %c0_i32_1 = arith.constant 0 : i32
    return %c0_i32, %c0_i32_0 : i32, i32
  }
  func.func @transform_2(%arg0: i32, %arg1: i32, %arg2: i32) -> (i32, i32) {
    %c0_i32 = arith.constant 0 : i32
    %c0_i32_0 = arith.constant 0 : i32
    %c0_i32_1 = arith.constant 0 : i32
    return %c0_i32, %c0_i32_0 : i32, i32
  }
  func.func @transform_3(%arg0: i32, %arg1: i32, %arg2: i32) -> (i32, i32) {
    %c0_i32 = arith.constant 0 : i32
    %c0_i32_0 = arith.constant 0 : i32
    %c0_i32_1 = arith.constant 0 : i32
    return %c0_i32, %c0_i32_0 : i32, i32
  }
  func.func @transform_4(%arg0: i32, %arg1: i32, %arg2: i32) -> (i32, i32, i32) {
    %c0_i32 = arith.constant 0 : i32
    %c0_i32_0 = arith.constant 0 : i32
    return %arg0, %c0_i32, %arg2 : i32, i32, i32
  }
}

</mosaic_0001>

<bundles_post_ra>
// kernel: conv_dropout_norm_relu.1
= control target key start
LH: loop header
LB: loop body
LE: loop exit
PB: predicated region body
PF: predicated region fallthrough
CT: control target
= control target key end

     0   :  { %s929_s15 = smov 0   ;;  %s931_s16 = smov 0   ;;  %s1082_s0 = inlined_call_operand.vmem [shape: bf16[2,112,512], index: 0, kind: input, shape index: {}]   ;;  %s1083_s1 = inlined_call_operand.vmem [shape: bf16[8,112], index: 1, kind: input, shape index: {}]   ;;  %s1084_s2 = inlined_call_operand.vmem [shape: f32[8,1], index: 2, kind: input, shape index: {}]   ;;  %s1085_s3 = inlined_call_operand.vmem [shape: f32[8,1], index: 3, kind: input, shape index: {}]   ;;  %s1086_s4 = inlined_call_operand.vmem [shape: f32[2,8,512], index: 4, kind: output, shape index: {}]  }
   0x1   :  { %s933_s17 = smov 0   ;;  %s935_s18 = smov 0  }
   0x2   :  { %s937_s19 = smov 0  }
   0x3 LB: > { %s29_s20 = sadd.s32 1, %s892_s17  ;;  %s33_s21 = sadd.s32 1, %s896_s18  ;;  %s900_s19 = sphi %s937_s19, %s14_s19   ;;  %s896_s18 = sphi %s935_s18, %s1090_s18   ;;  %s892_s17 = sphi %s933_s17, %s1089_s17   ;;  %s888_s16 = sphi %s931_s16, %s1088_s16   ;;  %s884_s15 = sphi %s929_s15, %s1087_s15  }
   0x4   : > { %p31_p0 = scmp.ge.s32.totalorder %s29_s20, 2  ;;  %p661_p1 = scmp.ge.s32.totalorder %s900_s19, 1 }
   0x5   : > { %p190_p2 = scmp.lt.s32.totalorder %s900_s19, 5 }
   0x6   : > { %s1092_s20 = smov (%p31_p0, %s29_s20), 0  ;;  %s1094_s21 = smov (!%p31_p0, %s33_s21), %s896_s18 }
   0x7   : > { %p191_p3 = pnand %p661_p1, %p190_p2  ;;  %p35_p4 = scmp.ge.s32.totalorder %s1094_s21, 2 }
   0x8   : > { %p225_p5 = scmp.lt.s32.totalorder (!%p191_p3), %s888_s16, 1  ;;  %p245_p6 = scmp.eq.s32.totalorder (!%p191_p3), %s884_s15, 0 }
   0x9   : > { %s1096_s21 = smov (%p35_p4, %s1094_s21), 0  ;;  %194 = sbr.rel (%p191_p3) target bundleno = 495 (0x1ef), region = 36 }
   0xe   : > { %s1098_s16 = smov (!%p225_p5, %s888_s16), 1  ;;  %250 = sbr.rel (!%p245_p6) target bundleno = 19 (0x13), region = 40  ;;  %vm251_vm0 = vcmask (%p245_p6), 7168   ;;  %v902_v0 = vmov (%p245_p6), 0.0  }
   0xf   : > { %s816_s22 = smul.u32 224, %s1098_s16  ;;  %s786_s23 = sshll.u32 %s1098_s16, 5  ;;  %252 = vst.msk [vmem:[#allocation2] sm:$0xff] (%p245_p6), %vm251_vm0, %v902_v0 }
  0x10   : > { %s965_s26 = scalar_lea.vmem %s1086_s4, %s786_s23  ;;  %253 = vst.msk [vmem:[#allocation3] sm:$0xff] (%p245_p6), %vm251_vm0, %v902_v0 }
  0x11   : > { %s970_s29 = scalar_lea.vmem %s1082_s0, %s816_s22 }
  0x13 PF: > { %v764_v1 = vld [vmem:[%s970_s29 + $0xc0] sm:$0xf]  ;;  %v814_v2 = vld [vmem:[%s970_s29 + $0xcc] sm:$0xf0]  ;;  %v812_v3 = vld [vmem:[%s970_s29 + $0xc4] sm:$0xf] }
  0x14   : > { %v765_v4 = vor.u32 %v814_v2, %v764_v1  ;;  %v766_v5 = vld [vmem:[%s970_s29 + $0xd0] sm:$0xf0]  ;;  %v772_v6 = vld [vmem:[%s970_s29 + $0xc8] sm:$0xf]  ;;  %v815_v7 = vld [vmem:[%s970_s29 + $0xd4] sm:$0xf0] }
  0x15   : > { %v769_v8 = vor.u32 %v812_v3, %v766_v5  ;;  %v773_v9 = vor.u32 %v815_v7, %v772_v6  ;;  %v813_v10 = vld [vmem:[%s970_s29 + $0xcc] sm:$0xf]  ;;  %v774_v11 = vld [vmem:[%s970_s29 + $0xd8] sm:$0xf0]  ;;  %v748_v12 = vld [vmem:[%s970_s29 + $0xa0] sm:$0xf] }
  0x16   : > { %428 = vmatpush.bf16.msra.mxu0 %v765_v4  ;;  %v777_v13 = vor.u32 %v813_v10, %v774_v11  ;;  %v810_v14 = vld [vmem:[%s970_s29 + $0xac] sm:$0xf0]  ;;  %v808_v15 = vld [vmem:[%s970_s29 + $0xa4] sm:$0xf]  ;;  %v750_v16 = vld [vmem:[%s970_s29 + $0xb0] sm:$0xf0] }
  0x17   : > { %441 = vmatpush.bf16.msra.mxu1 %v769_v8  ;;  %454 = vmatpush.bf16.msra.mxu2 %v773_v9  ;;  %v749_v17 = vor.u32 %v810_v14, %v748_v12  ;;  %v753_v18 = vor.u32 %v808_v15, %v750_v16  ;;  %v756_v19 = vld [vmem:[%s970_s29 + $0xa8] sm:$0xf]  ;;  %v811_v20 = vld [vmem:[%s970_s29 + $0xb4] sm:$0xf0]  ;;  %v809_v21 = vld [vmem:[%s970_s29 + $0xac] sm:$0xf] }
  0x18   : > { %467 = vmatpush.bf16.msra.mxu3 %v777_v13  ;;  %v757_v22 = vor.u32 %v811_v20, %v756_v19  ;;  %v758_v23 = vld [vmem:[%s970_s29 + $0xb8] sm:$0xf0]  ;;  %v732_v24 = vld [vmem:[%s970_s29 + $0x80] sm:$0xf]  ;;  %v806_v25 = vld [vmem:[%s970_s29 + $0x8c] sm:$0xf0] }
  0x19   : > { %v761_v26 = vor.u32 %v809_v21, %v758_v23  ;;  %v804_v27 = vld [vmem:[%s970_s29 + $0x84] sm:$0xf]  ;;  %v734_v28 = vld [vmem:[%s970_s29 + $0x90] sm:$0xf0]  ;;  %v740_v29 = vld [vmem:[%s970_s29 + $0x88] sm:$0xf]  ;;  %v733_v30 = vor.u32 %v806_v25, %v732_v24 }
  0x1a   : > { %429 = vmatpush.bf16.msra.mxu0 %v749_v17  ;;  %v807_v31 = vld [vmem:[%s970_s29 + $0x94] sm:$0xf0]  ;;  %v805_v32 = vld [vmem:[%s970_s29 + $0x8c] sm:$0xf]  ;;  %v742_v33 = vld [vmem:[%s970_s29 + $0x98] sm:$0xf0]  ;;  %v737_v34 = vor.u32 %v804_v27, %v734_v28 }
  0x1b   : > { %442 = vmatpush.bf16.msra.mxu1 %v753_v18  ;;  %455 = vmatpush.bf16.msra.mxu2 %v757_v22  ;;  %v741_v35 = vor.u32 %v807_v31, %v740_v29  ;;  %v716_v36 = vld [vmem:[%s970_s29 + $0x60] sm:$0xf]  ;;  %v802_v37 = vld [vmem:[%s970_s29 + $0x6c] sm:$0xf0]  ;;  %v800_v38 = vld [vmem:[%s970_s29 + $0x64] sm:$0xf]  ;;  %v745_v39 = vor.u32 %v805_v32, %v742_v33 }
  0x1c   : > { %468 = vmatpush.bf16.msra.mxu3 %v761_v26  ;;  %v718_v40 = vld [vmem:[%s970_s29 + $0x70] sm:$0xf0]  ;;  %v724_v41 = vld [vmem:[%s970_s29 + $0x68] sm:$0xf]  ;;  %v803_v42 = vld [vmem:[%s970_s29 + $0x74] sm:$0xf0]  ;;  %v717_v45 = vor.u32 %v802_v37, %v716_v36 }
  0x1d   : > { %v801_v43 = vld [vmem:[%s970_s29 + $0x6c] sm:$0xf]  ;;  %v726_v44 = vld [vmem:[%s970_s29 + $0x78] sm:$0xf0]  ;;  %v721_v46 = vor.u32 %v800_v38, %v718_v40  ;;  %v725_v47 = vor.u32 %v803_v42, %v724_v41  ;;  %v700_v48 = vld [vmem:[%s970_s29 + $0x40] sm:$0xf] }
  0x1e   : > { %430 = vmatpush.bf16.msra.mxu0 %v733_v30  ;;  %v798_v49 = vld [vmem:[%s970_s29 + $0x4c] sm:$0xf0]  ;;  %v796_v50 = vld [vmem:[%s970_s29 + $0x44] sm:$0xf]  ;;  %v729_v51 = vor.u32 %v801_v43, %v726_v44  ;;  %v702_v52 = vld [vmem:[%s970_s29 + $0x50] sm:$0xf0] }
  0x1f   : > { %443 = vmatpush.bf16.msra.mxu1 %v737_v34  ;;  %456 = vmatpush.bf16.msra.mxu2 %v741_v35  ;;  %v708_v53 = vld [vmem:[%s970_s29 + $0x48] sm:$0xf]  ;;  %v799_v54 = vld [vmem:[%s970_s29 + $0x54] sm:$0xf0]  ;;  %v797_v55 = vld [vmem:[%s970_s29 + $0x4c] sm:$0xf]  ;;  %v701_v57 = vor.u32 %v798_v49, %v700_v48  ;;  %v705_v58 = vor.u32 %v796_v50, %v702_v52 }
  0x20   : > { %469 = vmatpush.bf16.msra.mxu3 %v745_v39  ;;  %v710_v56 = vld [vmem:[%s970_s29 + $0x58] sm:$0xf0]  ;;  %v709_v59 = vor.u32 %v799_v54, %v708_v53  ;;  %v684_v60 = vld [vmem:[%s970_s29 + $0x20] sm:$0xf]  ;;  %v794_v61 = vld [vmem:[%s970_s29 + $0x2c] sm:$0xf0] }
  0x21   : > { %v792_v62 = vld [vmem:[%s970_s29 + $0x24] sm:$0xf]  ;;  %v713_v63 = vor.u32 %v797_v55, %v710_v56  ;;  %v686_v0 = vld [vmem:[%s970_s29 + $0x30] sm:$0xf0]  ;;  %v692_v1 = vld [vmem:[%s970_s29 + $0x28] sm:$0xf]  ;;  %v685_v5 = vor.u32 %v794_v61, %v684_v60 }
  0x22   : > { %431 = vmatpush.bf16.msra.mxu0 %v717_v45  ;;  %v795_v2 = vld [vmem:[%s970_s29 + $0x34] sm:$0xf0]  ;;  %v793_v3 = vld [vmem:[%s970_s29 + $0x2c] sm:$0xf]  ;;  %v694_v4 = vld [vmem:[%s970_s29 + $0x38] sm:$0xf0]  ;;  %v689_v6 = vor.u32 %v792_v62, %v686_v0 }
  0x23   : > { %444 = vmatpush.bf16.msra.mxu1 %v721_v46  ;;  %457 = vmatpush.bf16.msra.mxu2 %v725_v47  ;;  %v693_v7 = vor.u32 %v795_v2, %v692_v1  ;;  %v668_v8 = vld [vmem:[%s970_s29] sm:$0xf]  ;;  %v790_v9 = vld [vmem:[%s970_s29 + $0xc] sm:$0xf0]  ;;  %v788_v10 = vld [vmem:[%s970_s29 + $0x4] sm:$0xf]  ;;  %v697_v11 = vor.u32 %v793_v3, %v694_v4 }
  0x24   : > { %470 = vmatpush.bf16.msra.mxu3 %v729_v51  ;;  %v670_v12 = vld [vmem:[%s970_s29 + $0x10] sm:$0xf0]  ;;  %v676_v13 = vld [vmem:[%s970_s29 + $0x8] sm:$0xf]  ;;  %v791_v14 = vld [vmem:[%s970_s29 + $0x14] sm:$0xf0]  ;;  %v669_v17 = vor.u32 %v790_v9, %v668_v8 }
  0x25   : > { %v789_v15 = vld [vmem:[%s970_s29 + $0xc] sm:$0xf]  ;;  %v678_v16 = vld [vmem:[%s970_s29 + $0x18] sm:$0xf0]  ;;  %v673_v18 = vor.u32 %v788_v10, %v670_v12  ;;  %v677_v19 = vor.u32 %v791_v14, %v676_v13  ;;  %v254_v21 = vld [vmem:[%s1083_s1] sm:$0xf] }
  0x26   : > { %432 = vmatpush.bf16.msra.mxu0 %v701_v57  ;;  %v681_v20 = vor.u32 %v789_v15, %v678_v16  ;;  %vm423_vm1 = vcmask 916480   ;;  %p782_p7 = scmp.ne.s32.totalorder %s884_s15, 0 }
  0x27   : > { %445 = vmatpush.bf16.msra.mxu1 %v705_v58  ;;  %458 = vmatpush.bf16.msra.mxu2 %v709_v59 }
  0x28   : > { %471 = vmatpush.bf16.msra.mxu3 %v713_v63 }
  0x2a   : > { %433 = vmatpush.bf16.msra.mxu0 %v685_v5 }
  0x2b   : > { %446 = vmatpush.bf16.msra.mxu1 %v689_v6  ;;  %459 = vmatpush.bf16.msra.mxu2 %v693_v7 }
  0x2c   : > { %472 = vmatpush.bf16.msra.mxu3 %v697_v11 }
  0x2e   : > { %434 = vmatpush.bf16.msra.mxu0 %v669_v17 }
  0x2f   : > { %447 = vmatpush.bf16.msra.mxu1 %v673_v18  ;;  %460 = vmatpush.bf16.msra.mxu2 %v677_v19 }
  0x30   : > { %473 = vmatpush.bf16.msra.mxu3 %v681_v20 }
  0x31   : > { %778 = vmatmul.msk.bf16.vlgmr.msra.gmra.mxu0 %vm423_vm1, %v254_v21 }
  0x32   : > { %779 = vmatmul.msk.bf16.vlgmr.msra.gmra.mxu1 %vm423_vm1, %v254_v21  ;;  %780 = vmatmul.msk.bf16.vlgmr.msra.gmra.mxu2 %vm423_vm1, %v254_v21 }
  0x33   : > { %781 = vmatmul.msk.bf16.vlgmr.msra.gmra.mxu3 %vm423_vm1, %v254_v21 }
  0xae   : > { %v1031_v22 = vpop.f32.mrf.mxu0 }
  0xaf   : > { %v1033_v23 = vpop.f32.mrf.mxu1 }
  0xb5   : > { %v1035_v24 = vpop.f32.mrf.mxu2 }
  0xb6   : > { %v1037_v25 = vpop.f32.mrf.mxu3  ;;  %v438_v26 = vpop.f32.mrf.mxu0 }
  0xb7   : > { %v451_v27 = vpop.f32.mrf.mxu1 }
  0xba   : > { %481 = sbr.rel (%p782_p7) target bundleno = 324 (0x144), region = 44 }
  0xbd   : > { %v464_v28 = vpop.f32.mrf.mxu2 }
  0xbe   : > { %v477_v29 = vpop.f32.mrf.mxu3 }
  0xbf   : > { %v483_v30 = vadd.f32 %v1033_v23, %v1031_v22  ;;  %v492_v31 = vmul.f32 %v1031_v22, %v1031_v22  ;;  %v493_v32 = vmul.f32 %v1033_v23, %v1033_v23  ;;  %v494_v34 = vmul.f32 %v1035_v24, %v1035_v24  ;;  %v482_v40 = vld [vmem:[#allocation2] sm:$0xff]  ;;  %v491_v43 = vld [vmem:[#allocation3] sm:$0xff] }
  0xc0   : > { %v495_v37 = vmul.f32 %v1037_v25, %v1037_v25  ;;  %vm489_vm2 = vcmask 7168  }
  0xc1   : > { %v484_v33 = vadd.f32 %v483_v30, %v1035_v24  ;;  %v496_v35 = vadd.f32 %v493_v32, %v492_v31 }
  0xc3   : > { %v485_v36 = vadd.f32 %v484_v33, %v1037_v25  ;;  %v497_v38 = vadd.f32 %v496_v35, %v494_v34 }
  0xc5   : > { %486 = vadd.xlane.f32.xlu0 %v485_v36  ;;  %v498_v39 = vadd.f32 %v497_v38, %v495_v37 }
  0xcd   : > { %499 = vadd.xlane.f32.xlu0 %v498_v39 }
 0x138   : > { %v487_v41 = vpop.xlane.xlu0 %486 }
 0x139   : > { %v488_v42 = vadd.f32 %v487_v41, %v482_v40 }
 0x13b   : > { %490 = vst.msk [vmem:[#allocation2] sm:$0xff] %vm489_vm2, %v488_v42 }
 0x140   : > { %v500_v44 = vpop.xlane.xlu0 %499 }
 0x141   : > { %v501_v45 = vadd.f32 %v500_v44, %v491_v43 }
 0x143   : > { %502 = vst.msk [vmem:[#allocation3] sm:$0xff] %vm489_vm2, %v501_v45 }
 0x144 PF: > { %p783_p8 = scmp.ne.s32.totalorder %s884_s15, 1 }
 0x146   : > { %506 = sbr.rel (%p783_p8) target bundleno = 495 (0x1ef), region = 48 }
 0x14b   : > { %v507_v46 = vld [vmem:[#allocation2] sm:$0xff]  ;;  %v509_v47 = vld [vmem:[#allocation3] sm:$0xff]  ;;  %v903_v48 = vmov 0  }
 0x14c   : > { %859 = vset.pattern.permute.xlu0 %v903_v48  ;;  %v508_v49 = vmul.f32 0.001953125, %v507_v46  ;;  %v510_v50 = vmul.f32 0.001953125, %v509_v47  ;;  %v525_v61 = vld [vmem:[%s1084_s2] sm:$0xff] }
 0x14d   : > { %v527_v1 = vld [vmem:[%s1085_s3] sm:$0xff] }
 0x14e   : > { %v511_v51 = vmul.f32 %v508_v49, %v508_v49 }
 0x150   : > { %v512_v52 = vsub.f32 %v510_v50, %v511_v51 }
 0x152   : > { %v513_v53 = vmax.f32 %v512_v52, 0.0 }
 0x154   : > { %v514_v54 = vadd.f32 1e-05, %v513_v53 }
 0x156   : > { %860 = vrsqrt.f32 %v514_v54  ;;  %vm521_vm3 = vweird.f32 %v514_v54 }
 0x15c   : > { %v861_v55 = vpop.eup %860 }
 0x15d   : > { %v516_v56 = vmul.f32 %v861_v55, %v514_v54  ;;  %vm522_vm4 = vweird.f32 %v861_v55 }
 0x15e   : > { %vm523_vm5 = vmor %vm521_vm3, %vm522_vm4 }
 0x15f   : > { %v517_v57 = vmul.f32 %v861_v55, %v516_v56 }
 0x161   : > { %v518_v58 = vmul.f32 0.5, %v517_v57 }
 0x163   : > { %v519_v59 = vsub.f32 1.5, %v518_v58 }
 0x165   : > { %v520_v60 = vmul.f32 %v861_v55, %v519_v59 }
 0x167   : > { %v524_v62 = vsel %vm523_vm5, %v861_v55, %v520_v60 }
 0x168   : > { %v526_v63 = vmul.f32 %v525_v61, %v524_v62 }
 0x16a   : > { %532 = vperm.xlu0 %859, %v526_v63   ;;  %v528_v0 = vmul.f32 %v526_v63, %v508_v49 }
 0x16c   : > { %v529_v2 = vsub.f32 %v527_v1, %v528_v0 }
 0x172   : > { %541 = vperm.xlu0 %859, %v529_v2  }
 0x1dc   : > { %v533_v3 = vpop.permute.xlu0 %532 }
 0x1dd   : > { %v535_v4 = vmul.f32 %v533_v3, %v1031_v22  ;;  %v536_v5 = vmul.f32 %v533_v3, %v1033_v23  ;;  %v537_v6 = vmul.f32 %v533_v3, %v1035_v24  ;;  %v538_v7 = vmul.f32 %v533_v3, %v1037_v25 }
 0x1e4   : > { %v542_v8 = vpop.permute.xlu0 %541 }
 0x1e5   : > { %v544_v9 = vadd.f32 %v542_v8, %v535_v4  ;;  %v545_v10 = vadd.f32 %v542_v8, %v536_v5  ;;  %v546_v11 = vadd.f32 %v542_v8, %v537_v6  ;;  %v547_v12 = vadd.f32 %v542_v8, %v538_v7 }
 0x1e7   : > { %vm548_vm6 = vcmp.ge.f32.partialorder %v544_v9, 0.0  ;;  %vm549_vm7 = vcmp.ge.f32.partialorder %v545_v10, 0.0  ;;  %vm550_vm8 = vcmp.ge.f32.partialorder %v546_v11, 0.0  ;;  %vm551_vm9 = vcmp.ge.f32.partialorder %v547_v12, 0.0 }
 0x1e8   : > { %v552_v13 = vmul.f32 0.01, %v544_v9  ;;  %v553_v14 = vmul.f32 0.01, %v545_v10  ;;  %v554_v15 = vmul.f32 0.01, %v546_v11 }
 0x1e9   : > { %v555_v16 = vmul.f32 0.01, %v547_v12 }
 0x1ea   : > { %v556_v17 = vsel %vm548_vm6, %v544_v9, %v552_v13  ;;  %v557_v18 = vsel %vm549_vm7, %v545_v10, %v553_v14  ;;  %v558_v19 = vsel %vm550_vm8, %v546_v11, %v554_v15 }
 0x1eb   : > { %v559_v20 = vsel %vm551_vm9, %v547_v12, %v555_v16  ;;  %560 = vst [vmem:[%s965_s26] sm:$0xff] %v556_v17 }
 0x1ec   : > { %561 = vst [vmem:[%s965_s26 + $0x8] sm:$0xff] %v557_v18 }
 0x1ed   : > { %562 = vst [vmem:[%s965_s26 + $0x10] sm:$0xff] %v558_v19 }
 0x1ee   : > { %563 = vst [vmem:[%s965_s26 + $0x18] sm:$0xff] %v559_v20 }
 0x1ef PF: > { %s14_s19 = sadd.s32 1, %s900_s19   ;;  %s1087_s15 = smov %s892_s17 }
 0x1f0   : > { %p11_p9 = scmp.ge.s32.totalorder %s14_s19, 6   ;;  %s1088_s16 = smov %s896_s18 }
 0x1f1   : > { %s1089_s17 = smov %s1092_s20  ;;  %s1090_s18 = smov %s1096_s21 }
 0x1f2   :  { %13 = sbr.rel (!%p11_p9) target bundleno = 3 (0x3), region = 78 }

</bundles_post_ra>
